<compile_context>
chip_gen: v5e
topology: v5e:2x2
jax: 0.10.0
libtpu: 0.0.40
codegen_flags: <defaults>
</compile_context>

<pallas_src>
import functools

import jax
import jax.numpy as jnp
from jax.experimental import pallas as pl
from jax.experimental.pallas import tpu as pltpu


def timestep_embedding_kernel(x_ref, w1_ref, b1_ref, w2_ref, b2_ref, out_ref):
    # linear_1 (with cond_proj already folded into w1/x by the wrapper).
    # bf16 operands on the MXU, f32 accumulation.
    h = jnp.dot(x_ref[...], w1_ref[...], preferred_element_type=jnp.float32)
    h = h + b1_ref[...].astype(jnp.float32)

    # SiLU in f32 (sigmoid runs on the EUP slot).
    h = h * jax.nn.sigmoid(h)

    # linear_2: downcast activation only for the MXU, accumulate in f32.
    y = jnp.dot(h.astype(w2_ref.dtype), w2_ref[...],
                preferred_element_type=jnp.float32)
    y = y + b2_ref[...].astype(jnp.float32)

    # TODO(synk): post_act (SiLU) would be applied here when post_act_fn is set.
    out_ref[...] = y.astype(out_ref.dtype)


def timestep_embedding(sample, condition, wc, w1, b1, w2, b2,
                       *, tile_b=256, compute_dtype=jnp.bfloat16):
    """sample: [B, Cin], condition: [B, Ccond] or None,
       wc: [Ccond, Cin] or None (cond_proj weight, transposed, no bias),
       w1: [Cin, D], b1: [1, D], w2: [D, Dout], b2: [1, Dout]."""
    B, _ = sample.shape
    D = w1.shape[1]
    Dout = w2.shape[1]

    # ---- Fold cond_proj into linear_1 (wrapper-side, tiny weight prep) ----
    if condition is not None:
        wcw1 = jnp.dot(wc, w1, preferred_element_type=jnp.float32)
        x_cat = jnp.concatenate([sample, condition], axis=1)
        w_cat = jnp.concatenate([w1, wcw1.astype(w1.dtype)], axis=0)
    else:
        x_cat = sample
        w_cat = w1
    K = x_cat.shape[1]

    # ---- bf16 MXU operands (f32 accumulation inside the kernel) ----
    x_cat = x_cat.astype(compute_dtype)
    w_cat = w_cat.astype(compute_dtype)
    w2_c = w2.astype(compute_dtype)
    b1_f = b1.astype(jnp.float32)
    b2_f = b2.astype(jnp.float32)

    # ---- Batch tiling: tile_b multiple of 8, pad B up to a multiple of it ----
    tile_b = max(8, min(tile_b, ((B + 7) // 8) * 8))
    b_pad = ((B + tile_b - 1) // tile_b) * tile_b
    if b_pad != B:
        x_cat = jnp.pad(x_cat, ((0, b_pad - B), (0, 0)))

    grid = (b_pad // tile_b,)

    out = pl.pallas_call(
        timestep_embedding_kernel,
        out_shape=jax.ShapeDtypeStruct((b_pad, Dout), sample.dtype),
        grid=grid,
        in_specs=[
            pl.BlockSpec((tile_b, K), lambda i: (i, 0)),   # [sample | cond] tile
            pl.BlockSpec((K, D), lambda i: (0, 0)),        # fused linear_1 weight (VMEM-resident)
            pl.BlockSpec((1, D), lambda i: (0, 0)),        # linear_1 bias
            pl.BlockSpec((D, Dout), lambda i: (0, 0)),     # linear_2 weight (VMEM-resident)
            pl.BlockSpec((1, Dout), lambda i: (0, 0)),     # linear_2 bias
        ],
        out_specs=pl.BlockSpec((tile_b, Dout), lambda i: (i, 0)),
        compiler_params=pltpu.CompilerParams(
            dimension_semantics=("parallel",)),
    )(x_cat, w_cat, b1_f, w2_c, b2_f)

    return out[:B] if b_pad != B else out


if __name__ == "__main__":
    # Small shapes consistent with the module.
    B = 8                 # batch of timesteps
    in_channels = 32
    time_embed_dim = 128
    out_dim = 128         # out_dim=None -> time_embed_dim
    cond_proj_dim = 16

    key = jax.random.PRNGKey(0)
    ks = jax.random.split(key, 7)

    def uinit(k, shape, fan_in):
        bound = 1.0 / jnp.sqrt(float(fan_in))
        return jax.random.uniform(k, shape, jnp.float32, -bound, bound)

    # Parameters (stored as [in, out] for the kernel; biases as [1, out]).
    wc = uinit(ks[0], (cond_proj_dim, in_channels), cond_proj_dim)   # cond_proj (no bias)
    w1 = uinit(ks[1], (in_channels, time_embed_dim), in_channels)    # linear_1
    b1 = uinit(ks[2], (1, time_embed_dim), in_channels)
    w2 = uinit(ks[3], (time_embed_dim, out_dim), time_embed_dim)     # linear_2
    b2 = uinit(ks[4], (1, out_dim), time_embed_dim)

    sample = jax.random.normal(ks[5], (B, in_channels), jnp.float32)
    condition = jax.random.normal(ks[6], (B, cond_proj_dim), jnp.float32)

    run = jax.jit(functools.partial(timestep_embedding, tile_b=256))

    # --- with conditioning ---
    out = jax.block_until_ready(run(sample, condition, wc, w1, b1, w2, b2))

    x_ref = sample + condition @ wc
    h_ref = x_ref @ w1 + b1
    h_ref = h_ref * jax.nn.sigmoid(h_ref)
    y_ref = h_ref @ w2 + b2
    assert out.shape == (B, out_dim)
    # bf16 MXU operands (f32 accumulation) -> loosened tolerance vs f32 ref.
    assert jnp.allclose(out, y_ref, atol=3e-2, rtol=3e-2), (
        float(jnp.max(jnp.abs(out - y_ref))))

    # --- without conditioning (cond_proj is None in the module) ---
    out_nc = jax.block_until_ready(
        timestep_embedding(sample, None, None, w1, b1, w2, b2))
    h_nc = sample @ w1 + b1
    h_nc = h_nc * jax.nn.sigmoid(h_nc)
    y_nc = h_nc @ w2 + b2
    assert jnp.allclose(out_nc, y_nc, atol=3e-2, rtol=3e-2), (
        float(jnp.max(jnp.abs(out_nc - y_nc))))

    print("KERNEL_OK")
</pallas_src>

<mosaic_0001>
module attributes {stable_mosaic.version = 11 : i64} {
  func.func @timestep_embedding_kernel(%arg0: i32, %arg1: memref<8x48xbf16, #tpu.memory_space<vmem>>, %arg2: memref<48x128xbf16, #tpu.memory_space<vmem>>, %arg3: memref<1x128xf32, #tpu.memory_space<vmem>>, %arg4: memref<128x128xbf16, #tpu.memory_space<vmem>>, %arg5: memref<1x128xf32, #tpu.memory_space<vmem>>, %arg6: memref<8x128xf32, #tpu.memory_space<vmem>>) attributes {dimension_semantics = [#tpu.dimension_semantics<parallel>], iteration_bounds = array<i64: 1>, scalar_prefetch = 0 : i64, scratch_operands = 0 : i64, tpu.core_type = #tpu.core_type<tc>, window_params = [{transform_indices = @transform_0, window_bounds = array<i64: 8, 48>}, {pipeline_mode = #tpu.pipeline_mode<synchronous>, transform_indices = @transform_1, window_bounds = array<i64: 48, 128>}, {pipeline_mode = #tpu.pipeline_mode<synchronous>, transform_indices = @transform_2, window_bounds = array<i64: 1, 128>}, {pipeline_mode = #tpu.pipeline_mode<synchronous>, transform_indices = @transform_3, window_bounds = array<i64: 128, 128>}, {pipeline_mode = #tpu.pipeline_mode<synchronous>, transform_indices = @transform_4, window_bounds = array<i64: 1, 128>}, {transform_indices = @transform_5, window_bounds = array<i64: 8, 128>}]} {
    %c0 = arith.constant 0 : index
    %c0_0 = arith.constant 0 : index
    %0 = vector.load %arg1[%c0, %c0_0] : memref<8x48xbf16, #tpu.memory_space<vmem>>, vector<8x48xbf16>
    %c0_1 = arith.constant 0 : index
    %c0_2 = arith.constant 0 : index
    %1 = vector.load %arg2[%c0_1, %c0_2] : memref<48x128xbf16, #tpu.memory_space<vmem>>, vector<48x128xbf16>
    %cst = arith.constant dense<0.000000e+00> : vector<8x128xf32>
    %2 = tpu.matmul %0, %1, %cst {dimension_numbers = #tpu.dot_dimension_numbers<[1], [0], [0], [1], [0, 0, 1, 1], [], []>} : vector<8x48xbf16>, vector<48x128xbf16>, vector<8x128xf32> -> vector<8x128xf32>
    %c0_3 = arith.constant 0 : index
    %c0_4 = arith.constant 0 : index
    %3 = vector.load %arg3[%c0_3, %c0_4] : memref<1x128xf32, #tpu.memory_space<vmem>>, vector<1x128xf32>
    %4 = vector.broadcast %3 : vector<1x128xf32> to vector<8x128xf32>
    %5 = arith.addf %2, %4 : vector<8x128xf32>
    %6 = arith.negf %5 : vector<8x128xf32>
    %7 = math.exp %6 : vector<8x128xf32>
    %cst_5 = arith.constant 1.000000e+00 : f32
    %8 = vector.broadcast %cst_5 : f32 to vector<8x128xf32>
    %9 = arith.addf %8, %7 : vector<8x128xf32>
    %10 = arith.divf %8, %9 : vector<8x128xf32>
    %11 = arith.mulf %5, %10 : vector<8x128xf32>
    %12 = arith.truncf %11 : vector<8x128xf32> to vector<8x128xbf16>
    %c0_6 = arith.constant 0 : index
    %c0_7 = arith.constant 0 : index
    %13 = vector.load %arg4[%c0_6, %c0_7] : memref<128x128xbf16, #tpu.memory_space<vmem>>, vector<128x128xbf16>
    %cst_8 = arith.constant dense<0.000000e+00> : vector<8x128xf32>
    %14 = tpu.matmul %12, %13, %cst_8 {dimension_numbers = #tpu.dot_dimension_numbers<[1], [0], [0], [1], [0, 0, 1, 1], [], []>} : vector<8x128xbf16>, vector<128x128xbf16>, vector<8x128xf32> -> vector<8x128xf32>
    %c0_9 = arith.constant 0 : index
    %c0_10 = arith.constant 0 : index
    %15 = vector.load %arg5[%c0_9, %c0_10] : memref<1x128xf32, #tpu.memory_space<vmem>>, vector<1x128xf32>
    %16 = vector.broadcast %15 : vector<1x128xf32> to vector<8x128xf32>
    %17 = arith.addf %14, %16 : vector<8x128xf32>
    %c0_11 = arith.constant 0 : index
    %c0_12 = arith.constant 0 : index
    %18 = vector.load %arg6[%c0_11, %c0_12] : memref<8x128xf32, #tpu.memory_space<vmem>>, vector<8x128xf32>
    tpu.vector_store %arg6[%c0_11, %c0_12], %17 {strides = array<i32>} : memref<8x128xf32, #tpu.memory_space<vmem>>, vector<8x128xf32>,
    return
  }
  func.func @transform_0(%arg0: i32) -> (i32, i32) {
    %c0_i32 = arith.constant 0 : i32
    %c0_i32_0 = arith.constant 0 : i32
    return %arg0, %c0_i32 : i32, i32
  }
  func.func @transform_1(%arg0: i32) -> (i32, i32) {
    %c0_i32 = arith.constant 0 : i32
    %c0_i32_0 = arith.constant 0 : i32
    %c0_i32_1 = arith.constant 0 : i32
    return %c0_i32, %c0_i32_0 : i32, i32
  }
  func.func @transform_2(%arg0: i32) -> (i32, i32) {
    %c0_i32 = arith.constant 0 : i32
    %c0_i32_0 = arith.constant 0 : i32
    %c0_i32_1 = arith.constant 0 : i32
    return %c0_i32, %c0_i32_0 : i32, i32
  }
  func.func @transform_3(%arg0: i32) -> (i32, i32) {
    %c0_i32 = arith.constant 0 : i32
    %c0_i32_0 = arith.constant 0 : i32
    %c0_i32_1 = arith.constant 0 : i32
    return %c0_i32, %c0_i32_0 : i32, i32
  }
  func.func @transform_4(%arg0: i32) -> (i32, i32) {
    %c0_i32 = arith.constant 0 : i32
    %c0_i32_0 = arith.constant 0 : i32
    %c0_i32_1 = arith.constant 0 : i32
    return %c0_i32, %c0_i32_0 : i32, i32
  }
  func.func @transform_5(%arg0: i32) -> (i32, i32) {
    %c0_i32 = arith.constant 0 : i32
    %c0_i32_0 = arith.constant 0 : i32
    return %arg0, %c0_i32 : i32, i32
  }
}

</mosaic_0001>

<bundles_post_ra>
// kernel: timestep_embedding.1
= control target key start
LH: loop header
LB: loop body
LE: loop exit
PB: predicated region body
PF: predicated region fallthrough
CT: control target
= control target key end

     0   :  { %s353_s0 = inlined_call_operand.vmem [shape: bf16[8,48], index: 0, kind: input, shape index: {}]   ;;  %s354_s1 = inlined_call_operand.vmem [shape: bf16[48,128], index: 1, kind: input, shape index: {}]   ;;  %s355_s2 = inlined_call_operand.vmem [shape: f32[1,128], index: 2, kind: input, shape index: {}]   ;;  %s356_s3 = inlined_call_operand.vmem [shape: bf16[128,128], index: 3, kind: input, shape index: {}]   ;;  %s357_s4 = inlined_call_operand.vmem [shape: f32[1,128], index: 4, kind: input, shape index: {}]   ;;  %s358_s5 = inlined_call_operand.hbm [shape: f32[8,128], index: 5, kind: output, shape index: {}]  }
   0x1   :  { %v235_v0 = vld [vmem:[%s354_s1 + $0x10] sm:$0xff]  ;;  %v234_v1 = vld [vmem:[%s354_s1 + $0x8] sm:$0xff] }
   0x2   :  { %60 = vmatpush.bf16.msra.mxu0 %v235_v0 }
   0x3   :  { %10 = vsyncpa [#allocation3], 0  ;;  %v233_v2 = vld [vmem:[%s354_s1] sm:$0xff]  ;;  %vm51_vm0 = vcmask 392192   ;;  %v243_v4 = vld [vmem:[%s356_s3 + $0x38] sm:$0xff]  ;;  %s277_s17 = smov [#allocation2]  }
   0x4   :  { %v22_v3 = vld [vmem:[%s353_s0] sm:$0xf]  ;;  %157 = vmatpush.bf16.msra.mxu1 %v243_v4  ;;  %v242_v5 = vld [vmem:[%s356_s3 + $0x30] sm:$0xff]  ;;  %v241_v6 = vld [vmem:[%s356_s3 + $0x28] sm:$0xff]  ;;  %s176_s18 = sshll.u32 %s277_s17, 4  ;;  %s178_s21 = sshll.u32 %s358_s5, 4  ;;  %s177_s18 = int_to_ptr.vmem [resolvable:$true] %s176_s18  ;;  %s179_s21 = int_to_ptr.hbm [resolvable:$true] %s178_s21 }
   0x5   :  { %v240_v7 = vld [vmem:[%s356_s3 + $0x20] sm:$0xff]  ;;  %v239_v8 = vld [vmem:[%s356_s3 + $0x18] sm:$0xff]  ;;  %v238_v9 = vld [vmem:[%s356_s3 + $0x10] sm:$0xff] }
   0x6   :  { %61 = vmatpush.bf16.msra.mxu0 %v234_v1  ;;  %v237_v10 = vld [vmem:[%s356_s3 + $0x8] sm:$0xff]  ;;  %v236_v11 = vld [vmem:[%s356_s3] sm:$0xff] }
   0x7   :  { %v245_v12 = vld [vmem:[%s355_s2] ss:$0 sm:$0xff] }
   0x8   :  { %158 = vmatpush.bf16.msra.mxu1 %v242_v5  ;;  %v246_v31 = vld [vmem:[%s357_s4] ss:$0 sm:$0xff] }
   0xa   :  { %62 = vmatpush.bf16.msra.mxu0 %v233_v2 }
   0xc   :  { %159 = vmatpush.bf16.msra.mxu1 %v241_v6 }
   0xd   :  { %199 = vmatmul.msk.bf16.vlgmr.msra.gmra.mxu0 %vm51_vm0, %v22_v3 }
  0x10   :  { %160 = vmatpush.bf16.msra.mxu1 %v240_v7 }
  0x14   :  { %161 = vmatpush.bf16.msra.mxu1 %v239_v8 }
  0x18   :  { %162 = vmatpush.bf16.msra.mxu1 %v238_v9 }
  0x1c   :  { %163 = vmatpush.bf16.msra.mxu1 %v237_v10 }
  0x20   :  { %164 = vmatpush.bf16.msra.mxu1 %v236_v11 }
  0x8a   :  { %v64_v13 = vpop.f32.mrf.mxu0 }
  0x8b   :  { %v65_v14 = vadd.f32 %v245_v12, %v64_v13 }
  0x8d   :  { %v200_v15 = vmul.f32 -1.442695, %v65_v14 }
  0x8f   :  { %247 = vpow2.f32 %v200_v15 }
  0x92   :  { %v66_v16 = vpop.f32.mrf.mxu0 }
  0x95   :  { %v248_v17 = vpop.eup %247 }
  0x96   :  { %v71_v18 = vadd.f32 1.0, %v248_v17 }
  0x98   :  { %249 = vrcp.f32 %v71_v18  ;;  %v83_v22 = vand.u32 2147483648, %v71_v18  ;;  %v81_v24 = vand.u32 2147483647, %v71_v18  ;;  %vm77_vm2 = vweird.f32 %v71_v18 }
  0x9a   :  { %v84_v26 = vor.u32 1.1754944e-38, %v83_v22  ;;  %vm82_vm4 = vcmp.eq.f32.partialorder %v81_v24, 8.507059e+37 }
  0x9e   :  { %v250_v19 = vpop.eup %249 }
  0x9f   :  { %v73_v20 = vmul.f32 %v250_v19, %v71_v18  ;;  %vm78_vm1 = vweird.f32 %v250_v19 }
  0xa0   :  { %vm79_vm3 = vmor %vm77_vm2, %vm78_vm1 }
  0xa1   :  { %v74_v21 = vsub.f32 1.0, %v73_v20 }
  0xa3   :  { %v75_v23 = vmul.f32 %v250_v19, %v74_v21 }
  0xa5   :  { %v76_v25 = vadd.f32 %v250_v19, %v75_v23 }
  0xa7   :  { %v80_v27 = vsel %vm79_vm3, %v250_v19, %v76_v25 }
  0xa8   :  { %v85_v28 = vsel %vm82_vm4, %v84_v26, %v80_v27 }
  0xa9   :  { %v87_v29 = vmul.f32 %v85_v28, %v65_v14 }
  0xab   :  { %v88_v30 = vpack.c.bf16 %v87_v29, %v87_v29 }
  0xad   :  { %165 = vmatmul.bf16.vlgmr.msra.gmra.mxu1 %v88_v30 }
 0x12a   :  { %v166_v32 = vpop.f32.mrf.mxu1 }
 0x12b   :  { %v167_v33 = vadd.f32 %v246_v31, %v166_v32 }
 0x12d   :  { %170 = vst [vmem:[#allocation2] sm:$0xff] %v167_v33 }
 0x12e   :  { %181 = dma.vmem_to_hbm [thread:$0]  %s177_s18, 128, %s179_s21, [#allocation3]  }
 0x132   :  { %v168_v34 = vpop.f32.mrf.mxu1 }
 0x133   :  { %275 = dma.done.wait [#allocation3], 128  }
 0x134   :  { %276 = vsyncadd [#allocation3], 4294967168 }
 0x135   :  { %186 = vsyncpa [#allocation3], 1 }

</bundles_post_ra>
